<compile_context>
chip_gen: v6e
topology: v6e:2x2x1
jax: 0.10.0
libtpu: 0.0.40
codegen_flags: <defaults>
</compile_context>

<pallas_src>
import functools

import jax
import jax.numpy as jnp
from jax import lax
from jax.experimental import pallas as pl
from jax.experimental.pallas import tpu as pltpu

IMAGENET_MEAN = (0.485, 0.456, 0.406)
IMAGENET_STD = (0.229, 0.224, 0.225)

_LANE = 128
_SUBLANE = 8
_COL_CAP = 16384          # keep the folded lane dim bounded (row-tiling granularity)


def _cdiv(a, b):
    return -(-a // b)


def _vmem_params():
    """(per-step working-set budget, vmem_limit_bytes, fused-path footprint cap)
    derived from the chip generation."""
    cap = None
    try:
        cap = getattr(pltpu.get_tpu_info(), "vmem_capacity_bytes", None)
    except Exception:
        cap = None
    if cap is None:
        cap = 64 * 1024 * 1024                    # assume the smallest (v7x per-TC)
    if cap >= 100 * 1024 * 1024:                  # v5e / v6e: 128 MiB physical VMEM
        return 28 * 1024 * 1024, 64 * 1024 * 1024, 40 * 1024 * 1024
    # v7x: 64 MiB per TensorCore -- keep working set / limit modest.
    return 14 * 1024 * 1024, 40 * 1024 * 1024, 18 * 1024 * 1024


def _fold_plane(F, T):
    """Factor the contiguous F*T plane into (rows, cols) with cols % 128 == 0 and,
    when possible, rows a multiple of 8 (>= 8).  Pure contiguous reshape: free
    for the input and for every channel slab of the output."""
    N = F * T
    if N % _LANE != 0:
        return F, T                               # no lane-dense fold possible
    M = N // _LANE
    best = None
    d = 1
    while d * d <= M:
        if M % d == 0:
            for dd in (d, M // d):
                cols, rows = dd * _LANE, M // dd
                score = (rows % _SUBLANE == 0,    # sublane-dense tiles
                         rows >= _SUBLANE,        # avoid 7/8-padded vregs
                         min(cols, _COL_CAP),     # wide (but bounded) lane dim
                         rows)                    # tiling-granularity tiebreak
                if best is None or score > best[0]:
                    best = (score, rows, cols)
        d += 1
    _, rows, cols = best
    return rows, cols


def _pick_row_tile(rows, bytes_per_row, budget_bytes, min_steps=1):
    """Row-tile: a multiple of 8 (or the full extent) fitting `budget_bytes`,
    aiming for >= min_steps grid steps.  If no exact divisor is close, a cdiv
    grid with a ragged last block is used instead of blowing the budget."""
    max_rows = max(_SUBLANE, budget_bytes // max(1, bytes_per_row))
    if rows <= max_rows and min_steps <= 1:
        return rows
    target = max(1, min(max_rows, _cdiv(rows, max(1, min_steps))))
    if target >= rows:
        return rows
    r = max(_SUBLANE, (target // _SUBLANE) * _SUBLANE)
    # Prefer an exact divisor close to the budgeted tile (no ragged tail).
    d = r
    while d >= _SUBLANE:
        if rows % d == 0 and 2 * d >= r:
            return d
        d -= _SUBLANE
    return min(r, rows)


# -------------------- pass 1: global max (two-stage) --------------------
def _partial_max_kernel(x_ref, o_ref, *, total_rows, r_tile):
    x = x_ref[...].astype(jnp.float32)
    r, c = x.shape
    if total_rows % r_tile != 0:
        # cdiv grid: mask the overhang rows of the (ragged) last block.
        valid = total_rows - pl.program_id(0) * r_tile
        row_ids = lax.broadcasted_iota(jnp.int32, (r, c), 0)
        x = jnp.where(row_ids < valid, x, -jnp.inf)
    if r > _SUBLANE and r % _SUBLANE == 0:
        # Elementwise (VPU) partial reduce down to one sublane group; only the
        # final 8 x c -> scalar reduce touches the XLU.
        x = x.reshape(r // _SUBLANE, _SUBLANE, c).max(axis=0)
    o_ref[...] = jnp.full((_SUBLANE, _LANE), jnp.max(x), dtype=jnp.float32)


def _global_max(x2d, budget, limit):
    R, C = x2d.shape
    bytes_per_row = 2 * C * x2d.dtype.itemsize            # double-buffered input
    r_tile = _pick_row_tile(R, bytes_per_row, budget, min_steps=2)
    n = _cdiv(R, r_tile)
    kernel = functools.partial(_partial_max_kernel, total_rows=R, r_tile=r_tile)
    partials = pl.pallas_call(
        kernel,
        out_shape=jax.ShapeDtypeStruct((n * _SUBLANE, _LANE), jnp.float32),
        grid_spec=pltpu.PrefetchScalarGridSpec(
            num_scalar_prefetch=0,
            grid=(n,),
            in_specs=[pl.BlockSpec((r_tile, C), lambda i: (i, 0))],
            out_specs=pl.BlockSpec((_SUBLANE, _LANE), lambda i: (i, 0)),
        ),
        compiler_params=pltpu.CompilerParams(
            dimension_semantics=("parallel",),
            vmem_limit_bytes=limit),
    )(x2d)
    return jnp.max(partials)


# -------------------- pass 2: fused scale + RGB expand + normalize ------------
def _grey2rgb_kernel(maxv_ref, x_ref, o_ref):
    # maxv_ref: (1,) f32 in SMEM; x_ref: (1, r, c); o_ref: (1, 3, r, c)
    x = x_ref[0].astype(jnp.float32)
    inv_max = 1.0 / maxv_ref[0]
    for c in range(3):
        scale = inv_max * (1.0 / IMAGENET_STD[c])      # per-channel, 1 scalar op
        bias = IMAGENET_MEAN[c] / IMAGENET_STD[c]      # compile-time constant
        o_ref[0, c] = x * scale - bias


# -------------------- fused single-pass fast path --------------------
def _fused_kernel(x_ref, o_ref):
    # Whole array VMEM-resident: x_ref (B, rows, cols); o_ref (B, 3, rows, cols).
    x = x_ref[...].astype(jnp.float32)
    inv_max = 1.0 / jnp.max(x)
    for c in range(3):
        scale = inv_max * (1.0 / IMAGENET_STD[c])
        bias = IMAGENET_MEAN[c] / IMAGENET_STD[c]
        o_ref[:, c, :, :] = x * scale - bias


# -------------------- wrapper --------------------
def grey2rgb(data, *, force_two_pass=False):
    """data: (B, F, T) -> (B, 3, F, T) float32, matching the PyTorch module."""
    B, F, T = data.shape
    budget, limit, fused_cap = _vmem_params()

    rows, cols = _fold_plane(F, T)
    x = data.reshape(B, rows, cols)
    in_bytes = jnp.dtype(data.dtype).itemsize

    # ---- fused single-pass fast path (whole array VMEM-resident) ----
    footprint = B * rows * cols * (in_bytes + 3 * 4)
    if footprint <= fused_cap and not force_two_pass:
        out = pl.pallas_call(
            _fused_kernel,
            out_shape=jax.ShapeDtypeStruct((B, 3, rows, cols), jnp.float32),
            compiler_params=pltpu.CompilerParams(vmem_limit_bytes=limit),
        )(x)
        return out.reshape(B, 3, F, T)

    # ---- two-pass streaming path ----
    maxv = _global_max(x.reshape(B * rows, cols), budget, limit).reshape(1)

    bytes_per_row = 2 * cols * (in_bytes + 3 * 4)   # dbl-buffered in + 3 x f32 out
    r_tile = _pick_row_tile(rows, bytes_per_row, budget,
                            min_steps=2 if B == 1 else 1)
    n_r = _cdiv(rows, r_tile)

    out = pl.pallas_call(
        _grey2rgb_kernel,
        out_shape=jax.ShapeDtypeStruct((B, 3, rows, cols), jnp.float32),
        grid_spec=pltpu.PrefetchScalarGridSpec(
            num_scalar_prefetch=0,
            grid=(B, n_r),
            in_specs=[
                pl.BlockSpec(memory_space=pltpu.MemorySpace.SMEM),   # maxv (1,)
                pl.BlockSpec((1, r_tile, cols), lambda b, r: (b, r, 0)),
            ],
            out_specs=pl.BlockSpec((1, 3, r_tile, cols), lambda b, r: (b, 0, r, 0)),
        ),
        compiler_params=pltpu.CompilerParams(
            dimension_semantics=("parallel", "parallel"),
            vmem_limit_bytes=limit),
    )(maxv, x)

    return out.reshape(B, 3, F, T)


# -------------------- reference (pure JAX) --------------------
def grey2rgb_ref(data):
    data = data.astype(jnp.float32)
    data = data / jnp.max(data)
    data = jnp.broadcast_to(data[:, None, :, :],
                            (data.shape[0], 3, data.shape[1], data.shape[2]))
    mean = jnp.asarray(IMAGENET_MEAN, jnp.float32)[None, :, None, None]
    std = jnp.asarray(IMAGENET_STD, jnp.float32)[None, :, None, None]
    return (data - mean) / std


if __name__ == "__main__":
    key = jax.random.PRNGKey(0)

    # Small shape consistent with (batch, freq_bins, times): fused fast path.
    B, F, T = 2, 16, 16
    x = jax.random.uniform(key, (B, F, T), dtype=jnp.float32) + 0.1
    out = jax.block_until_ready(grey2rgb(x))
    ref = grey2rgb_ref(x)
    assert out.shape == (B, 3, F, T)
    assert out.dtype == jnp.float32
    assert jnp.allclose(out, ref, atol=1e-4, rtol=1e-5)

    # Also exercise the two-pass streaming path (partial-max + normalize kernels).
    B2, F2, T2 = 2, 256, 1024
    x2 = jax.random.uniform(jax.random.PRNGKey(0), (B2, F2, T2),
                            dtype=jnp.float32) + 0.1
    out2 = jax.block_until_ready(grey2rgb(x2, force_two_pass=True))
    ref2 = grey2rgb_ref(x2)
    assert out2.shape == (B2, 3, F2, T2)
    assert jnp.allclose(out2, ref2, atol=1e-4, rtol=1e-5)

    print("KERNEL_OK")
</pallas_src>

<mosaic_0001>
module attributes {stable_mosaic.version = 11 : i64} {
  func.func @_fused_kernel(%arg0: memref<2x1x256xf32, #tpu.memory_space<vmem>>, %arg1: memref<2x3x1x256xf32, #tpu.memory_space<vmem>>) attributes {dimension_semantics = [], scalar_prefetch = 0 : i64, scratch_operands = 0 : i64, tpu.core_type = #tpu.core_type<tc>} {
    %c0 = arith.constant 0 : index
    %c0_0 = arith.constant 0 : index
    %c0_1 = arith.constant 0 : index
    %0 = vector.load %arg0[%c0, %c0_0, %c0_1] : memref<2x1x256xf32, #tpu.memory_space<vmem>>, vector<2x1x256xf32>
    %1 = vector.shape_cast %0 : vector<2x1x256xf32> to vector<1x2x1x256xf32>
    %cst = arith.constant dense<0xFF800000> : vector<1xf32>
    %2 = vector.multi_reduction <maximumf>, %1, %cst [1, 2, 3] : vector<1x2x1x256xf32> to vector<1xf32>
    %3 = vector.shape_cast %2 : vector<1xf32> to vector<1x1x1x1xf32>
    %4 = vector.extract %3[0, 0, 0, 0] : f32 from vector<1x1x1x1xf32>
    %cst_2 = arith.constant 1.000000e+00 : f32
    %5 = arith.divf %cst_2, %4 : f32
    %cst_3 = arith.constant 4.36681223 : f32
    %6 = arith.mulf %5, %cst_3 : f32
    %7 = vector.broadcast %6 : f32 to vector<2x1x256xf32>
    %8 = arith.mulf %0, %7 : vector<2x1x256xf32>
    %cst_4 = arith.constant 2.11790395 : f32
    %9 = vector.broadcast %cst_4 : f32 to vector<2x1x256xf32>
    %10 = arith.subf %8, %9 : vector<2x1x256xf32>
    %c0_5 = arith.constant 0 : index
    %c0_6 = arith.constant 0 : index
    %c0_7 = arith.constant 0 : index
    %c0_8 = arith.constant 0 : index
    %11 = vector.load %arg1[%c0_5, %c0_6, %c0_7, %c0_8] : memref<2x3x1x256xf32, #tpu.memory_space<vmem>>, vector<2x1x1x256xf32>
    %12 = vector.shape_cast %11 : vector<2x1x1x256xf32> to vector<2x1x256xf32>
    %13 = vector.shape_cast %10 : vector<2x1x256xf32> to vector<2x1x1x256xf32>
    tpu.vector_store %arg1[%c0_5, %c0_6, %c0_7, %c0_8], %13 {strides = array<i32>} : memref<2x3x1x256xf32, #tpu.memory_space<vmem>>, vector<2x1x1x256xf32>,
    %cst_9 = arith.constant 4.46428585 : f32
    %14 = arith.mulf %5, %cst_9 : f32
    %15 = vector.broadcast %14 : f32 to vector<2x1x256xf32>
    %16 = arith.mulf %0, %15 : vector<2x1x256xf32>
    %cst_10 = arith.constant 2.03571439 : f32
    %17 = vector.broadcast %cst_10 : f32 to vector<2x1x256xf32>
    %18 = arith.subf %16, %17 : vector<2x1x256xf32>
    %c0_11 = arith.constant 0 : index
    %c1 = arith.constant 1 : index
    %c0_12 = arith.constant 0 : index
    %c0_13 = arith.constant 0 : index
    %19 = vector.load %arg1[%c0_11, %c1, %c0_12, %c0_13] : memref<2x3x1x256xf32, #tpu.memory_space<vmem>>, vector<2x1x1x256xf32>
    %20 = vector.shape_cast %19 : vector<2x1x1x256xf32> to vector<2x1x256xf32>
    %21 = vector.shape_cast %18 : vector<2x1x256xf32> to vector<2x1x1x256xf32>
    tpu.vector_store %arg1[%c0_11, %c1, %c0_12, %c0_13], %21 {strides = array<i32>} : memref<2x3x1x256xf32, #tpu.memory_space<vmem>>, vector<2x1x1x256xf32>,
    %cst_14 = arith.constant 4.44444466 : f32
    %22 = arith.mulf %5, %cst_14 : f32
    %23 = vector.broadcast %22 : f32 to vector<2x1x256xf32>
    %24 = arith.mulf %0, %23 : vector<2x1x256xf32>
    %cst_15 = arith.constant 1.80444443 : f32
    %25 = vector.broadcast %cst_15 : f32 to vector<2x1x256xf32>
    %26 = arith.subf %24, %25 : vector<2x1x256xf32>
    %c0_16 = arith.constant 0 : index
    %c2 = arith.constant 2 : index
    %c0_17 = arith.constant 0 : index
    %c0_18 = arith.constant 0 : index
    %27 = vector.load %arg1[%c0_16, %c2, %c0_17, %c0_18] : memref<2x3x1x256xf32, #tpu.memory_space<vmem>>, vector<2x1x1x256xf32>
    %28 = vector.shape_cast %27 : vector<2x1x1x256xf32> to vector<2x1x256xf32>
    %29 = vector.shape_cast %26 : vector<2x1x256xf32> to vector<2x1x1x256xf32>
    tpu.vector_store %arg1[%c0_16, %c2, %c0_17, %c0_18], %29 {strides = array<i32>} : memref<2x3x1x256xf32, #tpu.memory_space<vmem>>, vector<2x1x1x256xf32>,
    return
  }
}

</mosaic_0001>

<bundles_post_ra>
// kernel: tpu_custom_call.1
= control target key start
LH: loop header
LB: loop body
LE: loop exit
PB: predicated region body
PF: predicated region fallthrough
CT: control target
= control target key end

     0   :  { %6 = vsyncpa [#allocation3], 0  ;;  %s216_s0 = inlined_call_operand.hbm [shape: f32[2,1,256], index: 0, kind: input, shape index: {}]   ;;  %s217_s1 = inlined_call_operand.hbm [shape: f32[2,3,1,256], index: 1, kind: output, shape index: {}]  }
   0x1   :  { %7 = vsyncpa [#allocation4], 0  ;;  %s174_s6 = smov [#allocation2]  }
   0x2   :  { %s13_s7 = sshll.u32 %s174_s6, 4  ;;  %s14_s7 = int_to_ptr.vmem [resolvable:$true] %s13_s7 }
   0x3   :  { %s138_s8 = scalar_lea.vmem %s14_s7, 64  ;;  %p143_p1 = scmp.lt.s32.totalorder %s14_s7, %s14_s7 }
   0x4   :  { %p139_p0 = scmp.ne.s32.totalorder %s14_s7, %s138_s8  ;;  %p144_p2 = scmp.lt.s32.totalorder %s138_s8, %s138_s8 }
   0x6   :  { %p145_p3 = por %p144_p2, %p143_p1 }
   0x8   :  { %p146_p4 = pnand %p145_p3, %p139_p0 }
   0xa   :  { %149 = shalt.err (!%p146_p4)
}
   0xb   :  { %s175_s9 = smov 32   ;;  %s176_s10 = smov 2  }
   0xc   :  { %19 = dma.hbm_to_vmem [thread:$0]  %s216_s0, 64, %s14_s7, [#allocation3], %s175_s9, %s175_s9, %s176_s10  }
   0xd   :  { %170 = dma.done.wait [#allocation3], 64  }
   0xe   :  { %171 = vsyncadd [#allocation3], 4294967232  ;;  %v27_v0 = vlaneseq  ;;  %v23_v4 = vld [vmem:[#allocation2] sm:$0x3]  ;;  %v24_v5 = vld [vmem:[#allocation2 + $0x2] sm:$0x3] }
   0xf   :  { %vm47_vm0 = vcmask 1040384   ;;  %s177_s17 = smov [#allocation5]  }
  0x10   :  { %v28_v1 = vshrl.u32 %v27_v0, 7  ;;  %vm194_vm1 = vcmp.lt.s32.totalorder %v27_v0, 256  ;;  %s102_s18 = sshll.u32 %s177_s17, 4  ;;  %s103_s18 = int_to_ptr.vmem [resolvable:$true] %s102_s18 }
  0x11   :  { %s150_s19 = scalar_lea.vmem %s103_s18, 192  ;;  %p155_p6 = scmp.lt.s32.totalorder %s103_s18, %s103_s18 }
  0x12   :  { %v29_v2 = vsub.s32 0, %v28_v1  ;;  %v33_v3 = vsub.s32 1, %v28_v1  ;;  %p151_p5 = scmp.ne.s32.totalorder %s103_s18, %s150_s19  ;;  %p156_p7 = scmp.lt.s32.totalorder %s150_s19, %s150_s19 }
  0x14   :  { %v30_v6 = vrot.slane %v23_v4, %v29_v2  ;;  %v34_v7 = vrot.slane %v23_v4, %v33_v3  ;;  %v38_v8 = vrot.slane %v24_v5, %v29_v2  ;;  %v42_v9 = vrot.slane %v24_v5, %v33_v3  ;;  %p157_p8 = por %p156_p7, %p155_p6 }
  0x16   :  { %v48_v10 = vsel %vm47_vm0, %v30_v6, -inf  ;;  %v49_v11 = vsel %vm47_vm0, %v34_v7, -inf  ;;  %v50_v12 = vsel %vm47_vm0, %v38_v8, -inf  ;;  %v51_v13 = vsel %vm47_vm0, %v42_v9, -inf  ;;  %p158_p9 = pnand %p157_p8, %p151_p5 }
  0x17   :  { %v52_v14 = vmax.f32 %v48_v10, %v49_v11  ;;  %v53_v15 = vmax.f32 %v50_v12, %v51_v13 }
  0x19   :  { %v54_v16 = vmax.f32 %v52_v14, %v53_v15 }
  0x1b   :  { %55 = vmax.xlane.f32.xlu0 %v54_v16 }
  0xa4   :  { %v56_v17 = vpop.xlane.xlu0 %55 }
  0xa5   :  { %v57_v18 = vrot.slane %v56_v17, 4 }
  0xa7   :  { %v58_v19 = vmax.f32 %v56_v17, %v57_v18 }
  0xa9   :  { %v59_v20 = vrot.slane %v58_v19, 2 }
  0xab   :  { %v60_v21 = vmax.f32 %v58_v19, %v59_v20 }
  0xad   :  { %v61_v22 = vrot.slane %v60_v21, 1 }
  0xaf   :  { %v62_v23 = vmax.f32 %v60_v21, %v61_v22 }
  0xb1   :  { %120 = vpush %v62_v23 }
  0xe2   :  { %s121_s0 = spop %120 }
  0xe3   :  { %v64_v24 = vstv %s121_s0 }
  0xe4   :  { %128 = vrcp.f32 %v64_v24 }
  0xf1   :  { %v129_v25 = vpop.eup %128 }
  0xf2   :  { %122 = vpush %v129_v25 }
 0x123   :  { %s123_s13 = spop %122 }
 0x124   :  { %s67_s14 = smul.f32 4.366812, %s123_s13 }
 0x125   :  { %s79_s15 = smul.f32 4.464286, %s123_s13 }
 0x126   :  { %v68_v26 = vstv %s67_s14  ;;  %s88_s16 = smul.f32 4.4444447, %s123_s13 }
 0x127   :  { %v69_v27 = vmul.f32 %v68_v26, %v23_v4  ;;  %v70_v28 = vmul.f32 %v68_v26, %v24_v5  ;;  %v80_v29 = vstv %s79_s15 }
 0x128   :  { %v81_v31 = vmul.f32 %v80_v29, %v23_v4  ;;  %v82_v32 = vmul.f32 %v80_v29, %v24_v5  ;;  %v89_v33 = vstv %s88_s16 }
 0x129   :  { %v114_v34 = vadd.f32 -2.117904, %v69_v27  ;;  %v115_v35 = vadd.f32 -2.117904, %v70_v28  ;;  %v90_v36 = vmul.f32 %v89_v33, %v23_v4  ;;  %v91_v37 = vmul.f32 %v89_v33, %v24_v5 }
 0x12a   :  { %v116_v38 = vadd.f32 -2.0357144, %v81_v31  ;;  %v117_v39 = vadd.f32 -2.0357144, %v82_v32 }
 0x12b   :  { %77 = vst.msk [vmem:[#allocation5] sm:$0x3] %vm194_vm1, %v114_v34  ;;  %78 = vst.msk [vmem:[#allocation5 + $0x6] sm:$0x3] %vm194_vm1, %v115_v35  ;;  %v118_v40 = vadd.f32 -1.8044444, %v90_v36 }
 0x12c   :  { %v119_v41 = vadd.f32 -1.8044444, %v91_v37  ;;  %86 = vst.msk [vmem:[#allocation5 + $0x2] sm:$0x3] %vm194_vm1, %v116_v38  ;;  %87 = vst.msk [vmem:[#allocation5 + $0x8] sm:$0x3] %vm194_vm1, %v117_v39 }
 0x12d   :  { %95 = vst.msk [vmem:[#allocation5 + $0x4] sm:$0x3] %vm194_vm1, %v118_v40 }
 0x12e   :  { %96 = vst.msk [vmem:[#allocation5 + $0xa] sm:$0x3] %vm194_vm1, %v119_v41 }
 0x12f   :  { %161 = shalt.err (!%p158_p9)
}
 0x130   :  { %108 = dma.vmem_to_hbm [thread:$0]  %s103_s18, 192, %s217_s1, [#allocation4], %s175_s9, %s175_s9, %s176_s10  }
 0x131   :  { %172 = dma.done.wait [#allocation4], 192  }
 0x132   :  { %173 = vsyncadd [#allocation4], 4294967104 }
 0x133   :  { %112 = vsyncpa [#allocation3], 1 }
 0x134   :  { %113 = vsyncpa [#allocation4], 1 }

</bundles_post_ra>
